<compile_context>
chip_gen: v7x
topology: tpu7x:2x2x1
jax: 0.10.0
libtpu: 0.0.40
codegen_flags: <defaults>
</compile_context>

<pallas_src>
import functools
import math

import numpy as np
import jax
import jax.numpy as jnp
from jax import lax
from jax.experimental import pallas as pl
from jax.experimental.pallas import tpu as pltpu


def _round_up(v, m):
    return (v + m - 1) // m * m


@functools.lru_cache(maxsize=None)
def _build_basis(n_fft, win_length, Fp):
    """Windowed one-sided inverse-rDFT basis, cos and sin halves (host/numpy).

    basis_c[f, n] = win[n] * c_f *  cos(2*pi*f*n/n_fft) / n_fft
    basis_s[f, n] = win[n] * c_f * (-sin(2*pi*f*n/n_fft)) / n_fft
    with c_f = 1 at DC / Nyquist, 2 otherwise.  Rows f >= F are zero so the
    padded frequency bins never contribute (the sin row is zero at DC/Nyquist,
    which reproduces irfft's implicit discard of the imaginary part there).
    """
    F = n_fft // 2 + 1
    idx = np.arange(win_length, dtype=np.float64)
    window = 0.5 * (1.0 - np.cos(2.0 * np.pi * idx / win_length))  # periodic hann
    k = np.arange(Fp, dtype=np.float64)[:, None]                   # (Fp, 1)
    n = np.arange(n_fft, dtype=np.float64)[None, :]                # (1, n_fft)
    ang = 2.0 * np.pi * k * n / n_fft
    ck = np.where((k == 0) | (k == n_fft // 2), 1.0, 2.0)
    valid = k < F
    bc = np.where(valid, window[None, :] * ck * np.cos(ang) / n_fft, 0.0)
    bs = np.where(valid, window[None, :] * ck * (-np.sin(ang)) / n_fft, 0.0)
    return bc.astype(np.float32), bs.astype(np.float32)


@functools.lru_cache(maxsize=None)
def _build_inv_env(n_fft, hop, win_length, L):
    """1 / (overlap-added hann^2 envelope) on the kept ("same"-trimmed) range."""
    idx = np.arange(win_length, dtype=np.float64)
    window = 0.5 * (1.0 - np.cos(2.0 * np.pi * idx / win_length))
    w2 = window ** 2
    out_size = (L - 1) * hop + win_length
    env = np.zeros(out_size, np.float64)
    for t in range(L):
        env[t * hop:t * hop + win_length] += w2
    pad_amt = (win_length - hop) // 2
    kept = env[pad_amt:out_size - pad_amt]
    assert (kept > 1e-11).all(), "window envelope vanishes inside the kept range"
    return (1.0 / kept).astype(np.float32)


def _pick_defaults():
    """Generation-aware default frame tile + scoped-VMEM limit."""
    try:
        vmem_cap = getattr(pltpu.get_tpu_info(), "vmem_capacity_bytes", None)
    except Exception:
        vmem_cap = None
    if vmem_cap is not None and vmem_cap >= 96 * 1024 * 1024:
        return 1024, 64 * 1024 * 1024      # v5e / v6e class (128 MiB VMEM)
    return 512, 48 * 1024 * 1024           # v7x class (64 MiB VMEM) / unknown


def _make_kernel(*, Fp, hop, R, TL, L, mask_frames, compute_dtype):
    log_clip = math.log(100.0)
    tn_dims = (((0,), (0,)), ((), ()))     # A^T B contraction (frame-major conv)

    def kernel(x_ref, wm_ref, wp_ref, bm_ref, bp_ref, bc_ref, bs_ref,
               o_main_ref, o_tail_ref, acc_ref):
        x = x_ref[0]                                               # (H, TL)
        # 1x1 conv, frame-major: z[t, f] = sum_h x[h, t] * w[h, f]
        # (one MXU matmul per mag/phase half; f32 accumulation)
        zm = lax.dot_general(x, wm_ref[...], tn_dims,
                             preferred_element_type=jnp.float32) + bm_ref[...]
        zp = lax.dot_general(x, wp_ref[...], tn_dims,
                             preferred_element_type=jnp.float32) + bp_ref[...]
        # exp + clip-at-100 (clip folded into exp -> no transient inf)
        mag = jnp.exp(jnp.minimum(zm, log_clip))                   # (TL, Fp) f32
        if mask_frames:
            # Zero frames in the zero-padded tail of L.  Masking mag kills both
            # cos and sin branches; cost ~TL*Fp VPU ops, negligible vs. the MXU.
            t_abs = (pl.program_id(1) * TL
                     + lax.broadcasted_iota(jnp.int32, (TL, 1), 0))
            mag = jnp.where(t_abs < L, mag, 0.0)
        # keep transcendentals in f32 (v5e has no bf16 EUP); cast only the MXU RHS
        mc = (mag * jnp.cos(zp)).astype(compute_dtype)             # (TL, Fp)
        ms = (mag * jnp.sin(zp)).astype(compute_dtype)             # (TL, Fp)
        # windowed irfft, frame-major: two MXU matmuls, no spec concatenate
        frames = (jnp.dot(mc, bc_ref[...], preferred_element_type=jnp.float32)
                  + jnp.dot(ms, bs_ref[...], preferred_element_type=jnp.float32))
        # in-tile overlap-add into a VMEM scratch accumulator (shifted adds)
        acc_ref[pl.ds(0, TL), :] = frames[:, 0:hop]
        acc_ref[pl.ds(TL, R - 1), :] = jnp.zeros((R - 1, hop), jnp.float32)
        for r in range(1, R):
            acc_ref[pl.ds(r, TL), :] = (acc_ref[pl.ds(r, TL), :]
                                        + frames[:, r * hop:(r + 1) * hop])
        # lane-dense stores: main (TL, hop) + small tail (R-1, hop)
        o_main_ref[0, 0] = acc_ref[pl.ds(0, TL), :]
        o_tail_ref[0, 0] = acc_ref[pl.ds(TL, R - 1), :]

    return kernel


def istft_head_forward(x, weight, bias, *, n_fft, hop_length, win_length,
                       frames_per_tile=None, compute_dtype=jnp.bfloat16):
    """ISTFTHead forward: x (B, H, L) -> audio (B, L * hop_length)."""
    B, H, L = x.shape
    assert win_length == n_fft, "vocos ISTFT assumes win_length == n_fft"
    assert n_fft % hop_length == 0, "n_fft must be a multiple of hop_length"
    hop = hop_length
    R = n_fft // hop
    assert R >= 2, "vocos ISTFT assumes overlapping windows (n_fft > hop)"
    F = n_fft // 2 + 1
    Fp = _round_up(F, 16)                  # bf16 sublane-pack boundary

    default_tl, vmem_limit = _pick_defaults()
    if frames_per_tile is None:
        TL = L if L <= default_tl else default_tl
    else:
        TL = frames_per_tile
    assert TL == L or TL % 128 == 0, "frame tile must equal L or be a multiple of 128"
    assert TL >= R - 1
    NT = (L + TL - 1) // TL
    Lp = NT * TL

    pad_amt = (win_length - hop) // 2
    out_size = (L - 1) * hop + win_length
    T_out = out_size - 2 * pad_amt

    bc_np, bs_np = _build_basis(n_fft, win_length, Fp)
    inv_env_np = _build_inv_env(n_fft, hop, win_length, L)

    # ---- parameters, frame-major ("transposed"), zero-padded to Fp bins ------
    weight = weight.astype(jnp.float32)
    bias = bias.astype(jnp.float32)
    wm = jnp.zeros((H, Fp), jnp.float32).at[:, :F].set(weight[:F].T)
    wp = jnp.zeros((H, Fp), jnp.float32).at[:, :F].set(weight[n_fft:n_fft + F].T)
    bm = jnp.zeros((1, Fp), jnp.float32).at[0, :F].set(bias[:F])
    bp = jnp.zeros((1, Fp), jnp.float32).at[0, :F].set(bias[n_fft:n_fft + F])

    x_p = x if Lp == L else jnp.pad(x, ((0, 0), (0, 0), (0, Lp - L)))
    # bf16 MXU operands by default (f32 accumulation): the kernel is MXU-bound.
    x_p = x_p.astype(compute_dtype)
    wm = wm.astype(compute_dtype)
    wp = wp.astype(compute_dtype)
    bc = jnp.asarray(bc_np).astype(compute_dtype)
    bs = jnp.asarray(bs_np).astype(compute_dtype)

    kernel = _make_kernel(Fp=Fp, hop=hop, R=R, TL=TL, L=L,
                          mask_frames=(Lp != L), compute_dtype=compute_dtype)

    cbytes = np.dtype(compute_dtype).itemsize
    flops = 4 * B * NT * TL * Fp * (H + n_fft)          # two conv + two basis matmuls
    transcendentals = 3 * B * NT * TL * Fp               # exp, cos, sin
    bytes_accessed = (B * H * Lp * cbytes
                      + B * NT * (TL + R - 1) * hop * 4
                      + (2 * H * Fp + 2 * Fp * n_fft) * cbytes
                      + 2 * Fp * 4)

    main, tail = pl.pallas_call(
        kernel,
        out_shape=(jax.ShapeDtypeStruct((B, NT, TL, hop), jnp.float32),
                   jax.ShapeDtypeStruct((B, NT, R - 1, hop), jnp.float32)),
        grid_spec=pltpu.PrefetchScalarGridSpec(
            num_scalar_prefetch=0,
            grid=(B, NT),
            in_specs=[
                pl.BlockSpec((1, H, TL), lambda b, i: (b, 0, i)),      # x tile
                pl.BlockSpec((H, Fp), lambda b, i: (0, 0)),            # W_mag^T
                pl.BlockSpec((H, Fp), lambda b, i: (0, 0)),            # W_phase^T
                pl.BlockSpec((1, Fp), lambda b, i: (0, 0)),            # b_mag
                pl.BlockSpec((1, Fp), lambda b, i: (0, 0)),            # b_phase
                pl.BlockSpec((Fp, n_fft), lambda b, i: (0, 0)),        # cos basis
                pl.BlockSpec((Fp, n_fft), lambda b, i: (0, 0)),        # sin basis
            ],
            out_specs=(
                pl.BlockSpec((1, 1, TL, hop), lambda b, i: (b, i, 0, 0)),
                pl.BlockSpec((1, 1, R - 1, hop), lambda b, i: (b, i, 0, 0)),
            ),
            scratch_shapes=[pltpu.VMEM((TL + R - 1, hop), jnp.float32)],
        ),
        compiler_params=pltpu.CompilerParams(
            dimension_semantics=("parallel", "parallel"),
            vmem_limit_bytes=vmem_limit,
        ),
        cost_estimate=pl.CostEstimate(flops=int(flops),
                                      transcendentals=int(transcendentals),
                                      bytes_accessed=int(bytes_accessed)),
    )(x_p, wm, wp, bm, bp, bc, bs)

    # ---- cross-tile stitch: reshape + pad + add (no transpose), fused with the
    # window-envelope normalization and the "same"-padding edge trim -----------
    y = main.reshape(B, NT * TL * hop)
    y_len = NT * TL * hop + (R - 1) * hop
    y = jnp.pad(y, ((0, 0), (0, (R - 1) * hop)))
    tail_flat = tail.reshape(B, NT, (R - 1) * hop)
    tail_flat = jnp.pad(tail_flat, ((0, 0), (0, 0), (0, (TL - (R - 1)) * hop)))
    tail_flat = tail_flat.reshape(B, NT * TL * hop)
    y = y + jnp.pad(tail_flat, ((0, 0), (TL * hop, 0)))[:, :y_len]
    inv_env = jnp.asarray(inv_env_np)
    return y[:, pad_amt:pad_amt + T_out] * inv_env[None, :]


# ----------------------------------------------------------------------------
# Pure-JAX reference (mirrors the PyTorch ISTFTHead + vocos ISTFT "same")
# ----------------------------------------------------------------------------
def reference_forward(x, weight, bias, *, n_fft, hop_length, win_length):
    B, H, L = x.shape
    z = jnp.einsum('oh,bhl->bol', weight, x) + bias[None, :, None]
    mag = jnp.minimum(jnp.exp(z[:, :n_fft]), 100.0)
    p = z[:, n_fft:]
    S = mag * (jnp.cos(p) + 1j * jnp.sin(p))
    F = n_fft // 2 + 1
    S = S[:, :F]
    # irfft ignores imaginary parts at DC / Nyquist (Hermitian assumption)
    S = S.at[:, 0].set(S[:, 0].real.astype(S.dtype))
    S = S.at[:, n_fft // 2].set(S[:, n_fft // 2].real.astype(S.dtype))
    ifft = jnp.fft.irfft(S, n=n_fft, axis=1)                       # (B, n_fft, L)
    window = (0.5 * (1.0 - jnp.cos(2.0 * jnp.pi * jnp.arange(win_length) / win_length))
              ).astype(jnp.float32)
    ifft = ifft * window[None, :, None]
    out_size = (L - 1) * hop_length + win_length
    pad = (win_length - hop_length) // 2
    y = jnp.zeros((B, out_size), jnp.float32)
    env = jnp.zeros(out_size, jnp.float32)
    for t in range(L):
        y = y.at[:, t * hop_length:t * hop_length + win_length].add(ifft[:, :, t])
        env = env.at[t * hop_length:t * hop_length + win_length].add(window ** 2)
    return y[:, pad:out_size - pad] / env[pad:out_size - pad]


if __name__ == "__main__":
    key = jax.random.PRNGKey(0)

    configs = [
        # (B, dim, L, n_fft, hop, frames_per_tile)
        (2, 32, 8, 16, 4, None),     # single tile per batch element
        (2, 32, 160, 16, 4, 128),    # multi-tile: tail stitch + frame masking
    ]
    for (B, dim, L, n_fft, hop_length, tile) in configs:
        win_length = n_fft
        key, kx, kw, kb = jax.random.split(key, 4)
        x = jax.random.normal(kx, (B, dim, L), dtype=jnp.float32)
        # deterministic synthetic Conv1d(dim, 2*n_fft, 1) parameters
        weight = 0.05 * jax.random.normal(kw, (2 * n_fft, dim), dtype=jnp.float32)
        bias = 0.02 * jax.random.normal(kb, (2 * n_fft,), dtype=jnp.float32)

        y_ref = np.asarray(reference_forward(x, weight, bias, n_fft=n_fft,
                                             hop_length=hop_length,
                                             win_length=win_length))

        # f32 MXU operands: tight elementwise check
        y32 = istft_head_forward(x, weight, bias, n_fft=n_fft, hop_length=hop_length,
                                 win_length=win_length, frames_per_tile=tile,
                                 compute_dtype=jnp.float32)
        y32 = np.asarray(jax.block_until_ready(y32))
        np.testing.assert_allclose(y32, y_ref, rtol=2e-3, atol=2e-3)

        # default path (bf16 MXU operands, f32 accumulation): relative-L2 check
        ybf = istft_head_forward(x, weight, bias, n_fft=n_fft, hop_length=hop_length,
                                 win_length=win_length, frames_per_tile=tile)
        ybf = np.asarray(jax.block_until_ready(ybf))
        rel = np.linalg.norm(ybf - y_ref) / np.linalg.norm(y_ref)
        assert rel < 5e-2, f"bf16 relative L2 error too large: {rel}"

    print("KERNEL_OK")
</pallas_src>

<mosaic_0001>
module attributes {stable_mosaic.version = 11 : i64} {
  func.func @kernel(%arg0: i32, %arg1: i32, %arg2: memref<1x32x8xf32, #tpu.memory_space<vmem>>, %arg3: memref<32x16xf32, #tpu.memory_space<vmem>>, %arg4: memref<32x16xf32, #tpu.memory_space<vmem>>, %arg5: memref<1x16xf32, #tpu.memory_space<vmem>>, %arg6: memref<1x16xf32, #tpu.memory_space<vmem>>, %arg7: memref<16x16xf32, #tpu.memory_space<vmem>>, %arg8: memref<16x16xf32, #tpu.memory_space<vmem>>, %arg9: memref<1x1x8x4xf32, #tpu.memory_space<vmem>>, %arg10: memref<1x1x3x4xf32, #tpu.memory_space<vmem>>, %arg11: memref<11x4xf32, #tpu.memory_space<vmem>>) attributes {dimension_semantics = [#tpu.dimension_semantics<parallel>, #tpu.dimension_semantics<parallel>], iteration_bounds = array<i64: 2, 1>, scalar_prefetch = 0 : i64, scratch_operands = 1 : i64, tpu.core_type = #tpu.core_type<tc>, window_params = [{transform_indices = @transform_0, window_bounds = array<i64: 1, 32, 8>}, {pipeline_mode = #tpu.pipeline_mode<synchronous>, transform_indices = @transform_1, window_bounds = array<i64: 32, 16>}, {pipeline_mode = #tpu.pipeline_mode<synchronous>, transform_indices = @transform_2, window_bounds = array<i64: 32, 16>}, {pipeline_mode = #tpu.pipeline_mode<synchronous>, transform_indices = @transform_3, window_bounds = array<i64: 1, 16>}, {pipeline_mode = #tpu.pipeline_mode<synchronous>, transform_indices = @transform_4, window_bounds = array<i64: 1, 16>}, {pipeline_mode = #tpu.pipeline_mode<synchronous>, transform_indices = @transform_5, window_bounds = array<i64: 16, 16>}, {pipeline_mode = #tpu.pipeline_mode<synchronous>, transform_indices = @transform_6, window_bounds = array<i64: 16, 16>}, {transform_indices = @transform_7, window_bounds = array<i64: 1, 1, 8, 4>}, {transform_indices = @transform_8, window_bounds = array<i64: 1, 1, 3, 4>}]} {
    %c0 = arith.constant 0 : index
    %c0_0 = arith.constant 0 : index
    %c0_1 = arith.constant 0 : index
    %0 = vector.load %arg2[%c0, %c0_0, %c0_1] : memref<1x32x8xf32, #tpu.memory_space<vmem>>, vector<1x32x8xf32>
    %1 = vector.shape_cast %0 : vector<1x32x8xf32> to vector<32x8xf32>
    %c0_2 = arith.constant 0 : index
    %c0_3 = arith.constant 0 : index
    %2 = vector.load %arg3[%c0_2, %c0_3] : memref<32x16xf32, #tpu.memory_space<vmem>>, vector<32x16xf32>
    %cst = arith.constant dense<0.000000e+00> : vector<8x16xf32>
    %3 = tpu.matmul %1, %2, %cst {dimension_numbers = #tpu.dot_dimension_numbers<[0], [0], [1], [1], [0, 1, 1, 1], [], []>} : vector<32x8xf32>, vector<32x16xf32>, vector<8x16xf32> -> vector<8x16xf32>
    %c0_4 = arith.constant 0 : index
    %c0_5 = arith.constant 0 : index
    %4 = vector.load %arg5[%c0_4, %c0_5] : memref<1x16xf32, #tpu.memory_space<vmem>>, vector<1x16xf32>
    %5 = vector.broadcast %4 : vector<1x16xf32> to vector<8x16xf32>
    %6 = arith.addf %3, %5 : vector<8x16xf32>
    %c0_6 = arith.constant 0 : index
    %c0_7 = arith.constant 0 : index
    %7 = vector.load %arg4[%c0_6, %c0_7] : memref<32x16xf32, #tpu.memory_space<vmem>>, vector<32x16xf32>
    %cst_8 = arith.constant dense<0.000000e+00> : vector<8x16xf32>
    %8 = tpu.matmul %1, %7, %cst_8 {dimension_numbers = #tpu.dot_dimension_numbers<[0], [0], [1], [1], [0, 1, 1, 1], [], []>} : vector<32x8xf32>, vector<32x16xf32>, vector<8x16xf32> -> vector<8x16xf32>
    %c0_9 = arith.constant 0 : index
    %c0_10 = arith.constant 0 : index
    %9 = vector.load %arg6[%c0_9, %c0_10] : memref<1x16xf32, #tpu.memory_space<vmem>>, vector<1x16xf32>
    %10 = vector.broadcast %9 : vector<1x16xf32> to vector<8x16xf32>
    %11 = arith.addf %8, %10 : vector<8x16xf32>
    %cst_11 = arith.constant 4.60517025 : f32
    %12 = vector.broadcast %cst_11 : f32 to vector<8x16xf32>
    %13 = arith.minimumf %6, %12 : vector<8x16xf32>
    %14 = math.exp %13 : vector<8x16xf32>
    %15 = math.cos %11 : vector<8x16xf32>
    %16 = arith.mulf %14, %15 : vector<8x16xf32>
    %17 = math.sin %11 : vector<8x16xf32>
    %18 = arith.mulf %14, %17 : vector<8x16xf32>
    %c0_12 = arith.constant 0 : index
    %c0_13 = arith.constant 0 : index
    %19 = vector.load %arg7[%c0_12, %c0_13] : memref<16x16xf32, #tpu.memory_space<vmem>>, vector<16x16xf32>
    %cst_14 = arith.constant dense<0.000000e+00> : vector<8x16xf32>
    %20 = tpu.matmul %16, %19, %cst_14 {dimension_numbers = #tpu.dot_dimension_numbers<[1], [0], [0], [1], [0, 0, 1, 1], [], []>} : vector<8x16xf32>, vector<16x16xf32>, vector<8x16xf32> -> vector<8x16xf32>
    %c0_15 = arith.constant 0 : index
    %c0_16 = arith.constant 0 : index
    %21 = vector.load %arg8[%c0_15, %c0_16] : memref<16x16xf32, #tpu.memory_space<vmem>>, vector<16x16xf32>
    %cst_17 = arith.constant dense<0.000000e+00> : vector<8x16xf32>
    %22 = tpu.matmul %18, %21, %cst_17 {dimension_numbers = #tpu.dot_dimension_numbers<[1], [0], [0], [1], [0, 0, 1, 1], [], []>} : vector<8x16xf32>, vector<16x16xf32>, vector<8x16xf32> -> vector<8x16xf32>
    %23 = arith.addf %20, %22 : vector<8x16xf32>
    %24 = vector.extract_strided_slice %23 {offsets = [0, 0], sizes = [8, 4], strides = [1, 1]} : vector<8x16xf32> to vector<8x4xf32>
    %c0_18 = arith.constant 0 : index
    %c0_19 = arith.constant 0 : index
    %25 = vector.load %arg11[%c0_18, %c0_19] : memref<11x4xf32, #tpu.memory_space<vmem>>, vector<8x4xf32>
    tpu.vector_store %arg11[%c0_18, %c0_19], %24 {strides = array<i32>} : memref<11x4xf32, #tpu.memory_space<vmem>>, vector<8x4xf32>,
    %cst_20 = arith.constant 0.000000e+00 : f32
    %26 = vector.broadcast %cst_20 : f32 to vector<3x4xf32>
    %c8 = arith.constant 8 : index
    %c0_21 = arith.constant 0 : index
    %27 = vector.load %arg11[%c8, %c0_21] : memref<11x4xf32, #tpu.memory_space<vmem>>, vector<3x4xf32>
    tpu.vector_store %arg11[%c8, %c0_21], %26 {strides = array<i32>} : memref<11x4xf32, #tpu.memory_space<vmem>>, vector<3x4xf32>,
    %c1 = arith.constant 1 : index
    %c0_22 = arith.constant 0 : index
    %28 = vector.load %arg11[%c1, %c0_22] : memref<11x4xf32, #tpu.memory_space<vmem>>, vector<8x4xf32>
    %29 = vector.extract_strided_slice %23 {offsets = [0, 4], sizes = [8, 4], strides = [1, 1]} : vector<8x16xf32> to vector<8x4xf32>
    %30 = arith.addf %28, %29 : vector<8x4xf32>
    %c1_23 = arith.constant 1 : index
    %c0_24 = arith.constant 0 : index
    %31 = vector.load %arg11[%c1_23, %c0_24] : memref<11x4xf32, #tpu.memory_space<vmem>>, vector<8x4xf32>
    tpu.vector_store %arg11[%c1_23, %c0_24], %30 {strides = array<i32>} : memref<11x4xf32, #tpu.memory_space<vmem>>, vector<8x4xf32>,
    %c2 = arith.constant 2 : index
    %c0_25 = arith.constant 0 : index
    %32 = vector.load %arg11[%c2, %c0_25] : memref<11x4xf32, #tpu.memory_space<vmem>>, vector<8x4xf32>
    %33 = vector.extract_strided_slice %23 {offsets = [0, 8], sizes = [8, 4], strides = [1, 1]} : vector<8x16xf32> to vector<8x4xf32>
    %34 = arith.addf %32, %33 : vector<8x4xf32>
    %c2_26 = arith.constant 2 : index
    %c0_27 = arith.constant 0 : index
    %35 = vector.load %arg11[%c2_26, %c0_27] : memref<11x4xf32, #tpu.memory_space<vmem>>, vector<8x4xf32>
    tpu.vector_store %arg11[%c2_26, %c0_27], %34 {strides = array<i32>} : memref<11x4xf32, #tpu.memory_space<vmem>>, vector<8x4xf32>,
    %c3 = arith.constant 3 : index
    %c0_28 = arith.constant 0 : index
    %36 = vector.load %arg11[%c3, %c0_28] : memref<11x4xf32, #tpu.memory_space<vmem>>, vector<8x4xf32>
    %37 = vector.extract_strided_slice %23 {offsets = [0, 12], sizes = [8, 4], strides = [1, 1]} : vector<8x16xf32> to vector<8x4xf32>
    %38 = arith.addf %36, %37 : vector<8x4xf32>
    %c3_29 = arith.constant 3 : index
    %c0_30 = arith.constant 0 : index
    %39 = vector.load %arg11[%c3_29, %c0_30] : memref<11x4xf32, #tpu.memory_space<vmem>>, vector<8x4xf32>
    tpu.vector_store %arg11[%c3_29, %c0_30], %38 {strides = array<i32>} : memref<11x4xf32, #tpu.memory_space<vmem>>, vector<8x4xf32>,
    %c0_31 = arith.constant 0 : index
    %c0_32 = arith.constant 0 : index
    %40 = vector.load %arg11[%c0_31, %c0_32] : memref<11x4xf32, #tpu.memory_space<vmem>>, vector<8x4xf32>
    %c0_33 = arith.constant 0 : index
    %c0_34 = arith.constant 0 : index
    %c0_35 = arith.constant 0 : index
    %c0_36 = arith.constant 0 : index
    %41 = vector.load %arg9[%c0_33, %c0_34, %c0_35, %c0_36] : memref<1x1x8x4xf32, #tpu.memory_space<vmem>>, vector<1x1x8x4xf32>
    %42 = vector.shape_cast %41 : vector<1x1x8x4xf32> to vector<8x4xf32>
    %43 = vector.shape_cast %40 : vector<8x4xf32> to vector<1x1x8x4xf32>
    tpu.vector_store %arg9[%c0_33, %c0_34, %c0_35, %c0_36], %43 {strides = array<i32>} : memref<1x1x8x4xf32, #tpu.memory_space<vmem>>, vector<1x1x8x4xf32>,
    %c8_37 = arith.constant 8 : index
    %c0_38 = arith.constant 0 : index
    %44 = vector.load %arg11[%c8_37, %c0_38] : memref<11x4xf32, #tpu.memory_space<vmem>>, vector<3x4xf32>
    %c0_39 = arith.constant 0 : index
    %c0_40 = arith.constant 0 : index
    %c0_41 = arith.constant 0 : index
    %c0_42 = arith.constant 0 : index
    %45 = vector.load %arg10[%c0_39, %c0_40, %c0_41, %c0_42] : memref<1x1x3x4xf32, #tpu.memory_space<vmem>>, vector<1x1x3x4xf32>
    %46 = vector.shape_cast %45 : vector<1x1x3x4xf32> to vector<3x4xf32>
    %47 = vector.shape_cast %44 : vector<3x4xf32> to vector<1x1x3x4xf32>
    tpu.vector_store %arg10[%c0_39, %c0_40, %c0_41, %c0_42], %47 {strides = array<i32>} : memref<1x1x3x4xf32, #tpu.memory_space<vmem>>, vector<1x1x3x4xf32>,
    return
  }
  func.func @transform_0(%arg0: i32, %arg1: i32) -> (i32, i32, i32) {
    %c0_i32 = arith.constant 0 : i32
    %c0_i32_0 = arith.constant 0 : i32
    return %arg0, %c0_i32, %arg1 : i32, i32, i32
  }
  func.func @transform_1(%arg0: i32, %arg1: i32) -> (i32, i32) {
    %c0_i32 = arith.constant 0 : i32
    %c0_i32_0 = arith.constant 0 : i32
    %c0_i32_1 = arith.constant 0 : i32
    return %c0_i32, %c0_i32_0 : i32, i32
  }
  func.func @transform_2(%arg0: i32, %arg1: i32) -> (i32, i32) {
    %c0_i32 = arith.constant 0 : i32
    %c0_i32_0 = arith.constant 0 : i32
    %c0_i32_1 = arith.constant 0 : i32
    return %c0_i32, %c0_i32_0 : i32, i32
  }
  func.func @transform_3(%arg0: i32, %arg1: i32) -> (i32, i32) {
    %c0_i32 = arith.constant 0 : i32
    %c0_i32_0 = arith.constant 0 : i32
    %c0_i32_1 = arith.constant 0 : i32
    return %c0_i32, %c0_i32_0 : i32, i32
  }
  func.func @transform_4(%arg0: i32, %arg1: i32) -> (i32, i32) {
    %c0_i32 = arith.constant 0 : i32
    %c0_i32_0 = arith.constant 0 : i32
    %c0_i32_1 = arith.constant 0 : i32
    return %c0_i32, %c0_i32_0 : i32, i32
  }
  func.func @transform_5(%arg0: i32, %arg1: i32) -> (i32, i32) {
    %c0_i32 = arith.constant 0 : i32
    %c0_i32_0 = arith.constant 0 : i32
    %c0_i32_1 = arith.constant 0 : i32
    return %c0_i32, %c0_i32_0 : i32, i32
  }
  func.func @transform_6(%arg0: i32, %arg1: i32) -> (i32, i32) {
    %c0_i32 = arith.constant 0 : i32
    %c0_i32_0 = arith.constant 0 : i32
    %c0_i32_1 = arith.constant 0 : i32
    return %c0_i32, %c0_i32_0 : i32, i32
  }
  func.func @transform_7(%arg0: i32, %arg1: i32) -> (i32, i32, i32, i32) {
    %c0_i32 = arith.constant 0 : i32
    %c0_i32_0 = arith.constant 0 : i32
    %c0_i32_1 = arith.constant 0 : i32
    return %arg0, %arg1, %c0_i32, %c0_i32_0 : i32, i32, i32, i32
  }
  func.func @transform_8(%arg0: i32, %arg1: i32) -> (i32, i32, i32, i32) {
    %c0_i32 = arith.constant 0 : i32
    %c0_i32_0 = arith.constant 0 : i32
    %c0_i32_1 = arith.constant 0 : i32
    return %arg0, %arg1, %c0_i32, %c0_i32_0 : i32, i32, i32, i32
  }
}

</mosaic_0001>

<bundles_post_ra>
// kernel: tpu_custom_call.1
= control target key start
LH: loop header
LB: loop body
LE: loop exit
PB: predicated region body
PF: predicated region fallthrough
CT: control target
= control target key end

     0   :  { %s1288_s27 = smov 0   ;;  %s1290_s28 = smov 0   ;;  %s1406_s0 = inlined_call_operand.vmem [shape: f32[2,32,8], index: 0, kind: input, shape index: {}]   ;;  %s1407_s1 = inlined_call_operand.vmem [shape: f32[32,16], index: 1, kind: input, shape index: {}]   ;;  %s1408_s2 = inlined_call_operand.vmem [shape: f32[32,16], index: 2, kind: input, shape index: {}]   ;;  %s1409_s3 = inlined_call_operand.vmem [shape: f32[1,16], index: 3, kind: input, shape index: {}]   ;;  %s1410_s4 = inlined_call_operand.vmem [shape: f32[1,16], index: 4, kind: input, shape index: {}]   ;;  %s1411_s5 = inlined_call_operand.vmem [shape: f32[16,16], index: 5, kind: input, shape index: {}]   ;;  %s1412_s6 = inlined_call_operand.vmem [shape: f32[16,16], index: 6, kind: input, shape index: {}]   ;;  %s1413_s7 = inlined_call_operand.vmem [shape: f32[2,1,8,4], index: 7, kind: output, shape index: {0}]   ;;  %s1414_s8 = inlined_call_operand.vmem [shape: f32[2,1,3,4], index: 8, kind: output, shape index: {1}]  }
   0x1   :  { %s1292_s29 = smov 0  }
   0x2 LB: > { %s31_s30 = sadd.s32 1, %s1225_s28  ;;  %p1068_p0 = scmp.ge.s32.totalorder %s1229_s29, 1  ;;  %s1229_s29 = sphi %s1292_s29, %s19_s29   ;;  %s1225_s28 = sphi %s1290_s28, %s1416_s28   ;;  %s1221_s27 = sphi %s1288_s27, %s1415_s27  }
   0x3   : > { %p33_p1 = scmp.ge.s32.totalorder %s31_s30, 2  ;;  %p286_p2 = scmp.lt.s32.totalorder %s1229_s29, 3 }
   0x5   : > { %s1418_s30 = smov (%p33_p1, %s31_s30), 0  ;;  %p287_p3 = pnand %p1068_p0, %p286_p2 }
   0x6   : > { %p332_p4 = scmp.lt.s32.totalorder (!%p287_p3), %s1221_s27, 1  ;;  %v358_v0 = vld [vmem:[%s1407_s1] sm:$0xff] (!%p287_p3)  ;;  %v359_v1 = vld [vmem:[%s1407_s1 + $0x8] sm:$0xff] (!%p287_p3)  ;;  %v1231_v3 = vmov (!%p287_p3), 0.0|0.0   ;;  %v360_v6 = vld [vmem:[%s1407_s1 + $0x10] sm:$0xff] (!%p287_p3)  ;;  %vm921_vm0 = vcmask (!%p287_p3), 26624  }
   0x7   : > { %290 = sbr.rel (%p287_p3) target bundleno = 803 (0x323), region = 48  ;;  %v475_v2 = vld [vmem:[%s1408_s2] sm:$0xff] (!%p287_p3)  ;;  %1142 = vmatprep.subr.bf16.mxu0 (!%p287_p3), %v1231_v3  ;;  %1148 = vmatprep.subr.bf16.mxu1 (!%p287_p3), %v1231_v3  ;;  %v1143_v4 = vpack.c.bf16 (!%p287_p3), %v359_v1, %v358_v0  ;;  %v476_v5 = vld [vmem:[%s1408_s2 + $0x8] sm:$0xff] (!%p287_p3)  ;;  %v361_v7 = vld [vmem:[%s1407_s1 + $0x18] sm:$0xff] (!%p287_p3)  ;;  %vm1232_vm1 = vmmov (!%p287_p3), 0   ;;  %v1233_v11 = vmov (!%p287_p3), 0.0  }
   0x8   : > { %v1149_v8 = vpack.c.bf16 (!%p287_p3), %v476_v5, %v475_v2  ;;  %v477_v9 = vld [vmem:[%s1408_s2 + $0x10] sm:$0xff] (!%p287_p3)  ;;  %v478_v10 = vld [vmem:[%s1408_s2 + $0x18] sm:$0xff] (!%p287_p3)  ;;  %1114 = vmatprep.mubr.msk.f32.mxu0 (!%p287_p3), %vm1232_vm1, %v1233_v11  ;;  %922 = vst.msk [vmem:[#allocation2 + $0x8] sm:$0x7] (!%p287_p3), %vm921_vm0, %v1233_v11  ;;  %1125 = vmatprep.mubr.msk.f32.mxu1 (!%p287_p3), %vm1232_vm1, %v1233_v11  ;;  %v1146_v12 = vpack.c.bf16 (!%p287_p3), %v361_v7, %v360_v6  ;;  %vm401_vm2 = vcmask (!%p287_p3), 261120   ;;  %v770_v19 = vld [vmem:[%s1412_s6] sm:$0xff] (!%p287_p3) }
   0x9   : > { %1144 = vmatpush3.bf16.msra.mxu0 (!%p287_p3), %v1143_v4  ;;  %v1152_v13 = vpack.c.bf16 (!%p287_p3), %v478_v10, %v477_v9  ;;  %v771_v20 = vld [vmem:[%s1412_s6 + $0x8] sm:$0xff] (!%p287_p3)  ;;  %v768_v21 = vld [vmem:[%s1411_s5] sm:$0xff] (!%p287_p3)  ;;  %v1234_v41 = vmov (!%p287_p3), 683565275   ;;  %v1235_v43 = vmov (!%p287_p3), 2475754826  }
   0xa   : > { %1150 = vmatpush3.bf16.msra.mxu1 (!%p287_p3), %v1149_v8  ;;  %1145 = vmatprep.subr.bf16.mxu0 (!%p287_p3), %v1231_v3  ;;  %v1155_v22 = vpack.c.bf16 (!%p287_p3), %v771_v20, %v770_v19  ;;  %v769_v23 = vld [vmem:[%s1411_s5 + $0x8] sm:$0xff] (!%p287_p3)  ;;  %v1075_v25 = vld [vmem:[%s1410_s4] ss:$0 sm:$0xff] (!%p287_p3)  ;;  %v1236_v46 = vmov (!%p287_p3), 2131351028   ;;  %s1240_s23 = smov (!%p287_p3), 124  }
   0xb   : > { %1151 = vmatprep.subr.bf16.mxu1 (!%p287_p3), %v1231_v3  ;;  %v1158_v24 = vpack.c.bf16 (!%p287_p3), %v769_v23, %v768_v21  ;;  %v1237_v49 = vmov (!%p287_p3), 2102212464   ;;  %v1238_v52 = vmov (!%p287_p3), 920167782   ;;  %v1239_v55 = vmov (!%p287_p3), 1326507024  }
   0xc   : > { %s1241_s24 = smov (!%p287_p3), 120  }
   0xd   : > { %1147 = vmatpush3.bf16.msra.mxu0 (!%p287_p3), %v1146_v12 }
   0xe   : > { %s1420_s27 = smov (!%p332_p4, %s1221_s27), 1  ;;  %1153 = vmatpush3.bf16.msra.mxu1 %v1152_v13  ;;  %1157 = vmatprep.subr.bf16.mxu0 %v1231_v3 }
   0xf   : > { %s1089_s25 = sshll.u32 %s1420_s27, 5  ;;  %1154 = vmatprep.subr.bf16.mxu1 %v1231_v3  ;;  %s1071_s26 = sshll.u32 %s1420_s27, 3 }
  0x10   : > { %s339_s10 = scalar_lea.vmem %s1406_s0, %s1089_s25  ;;  %s1242_s25 = smov 116  }
  0x11   : > { %v354_v14 = vld [vmem:[%s339_s10] sm:$0xff]  ;;  %v355_v15 = vld [vmem:[%s339_s10 + $0x8] sm:$0xff]  ;;  %v356_v16 = vld [vmem:[%s339_s10 + $0x10] sm:$0xff]  ;;  %s1072_s9 = sshll.u32 %s1420_s27, 2  ;;  %s346_s12 = scalar_lea.vmem %s1413_s7, %s1071_s26 }
  0x12   : > { %369 = vxpose.xlu0.b32.start [1/4] (short) (narrow) %v354_v14, 8  ;;  %v357_v17 = vld [vmem:[%s339_s10 + $0x18] sm:$0xff]  ;;  %s353_s15 = scalar_lea.vmem %s1414_s8, %s1072_s9 }
  0x16   : > { %370 = vxpose.xlu0.b32.cont [2/4] (short) (narrow) %v355_v15, 8 }
  0x1a   : > { %371 = vxpose.xlu0.b32.cont [3/4] (short) (narrow) %v356_v16, 8 }
  0x1e   : > { %372 = vxpose.xlu0.b32.end [4/4] (short) (narrow) %v357_v17, 8 }
  0x92   : > { %v385_v18 = vpop.trf.xlu0 }
  0x93   : > { %1115 = vmatmul.mubr.msk.f32.vlgmr.msra.gmra.mrb[0].mxu0 %vm401_vm2, %v385_v18  ;;  %1126 = vmatmul.mubr.msk.f32.vlgmr.msra.gmra.mrb[0].mxu1 %vm401_vm2, %v385_v18 }
  0x94   : > { %1132 = vmatprep.mubr.msk.f32.mxu1 %vm1232_vm1, %v1233_v11  ;;  %1139 = vmatprep.mubr.msk.f32.mxu0 %vm1232_vm1, %v1233_v11 }
  0x95   : > { %1156 = vmatpush3.bf16.msra.mxu1 %v1155_v22  ;;  %1159 = vmatpush3.bf16.msra.mxu0 %v1158_v24 }
 0x166   : > { %v1356_v26 = vpop.f32.mrb[0].mxu0  ;;  %v552_v27 = vpop.f32.mrb[0].mxu1 }
 0x167   : > { %v1358_v28 = vadd.f32 %v1075_v25, %v552_v27  ;;  %v1116_v29 = vpop.f32.mrb[1].mxu0  ;;  %v1127_v30 = vpop.f32.mrb[1].mxu1 }
 0x169   : > { %v562_v31 = vand.u32 2139095040, %v1358_v28  ;;  %v559_v35 = vand.u32 2147483647, %v1358_v28  ;;  %vm561_vm10 = vcmp.lt.s32.totalorder %v1358_v28, 0 }
 0x16b   : > { %v563_v32 = vshrl.u32 %v562_v31, 23  ;;  %v566_v38 = vand.u32 8388607, %v559_v35  ;;  %vm560_vm11 = vcmp.le.f32.partialorder %v559_v35, 0.7853982 }
 0x16d   : > { %v1077_v33 = vadd.s32 4294967169, %v563_v32  ;;  %v567_v57 = vor.u32 8388608, %v566_v38 }
 0x16f   : > { %v569_v34 = vadd.s32 1, %v1077_v33  ;;  %v607_v7 = vshll.u32 %v567_v57, 8 }
 0x171   : > { %vm570_vm3 = vcmp.gt.s32.totalorder %v569_v34, 0 }
 0x172   : > { %v571_v36 = vsel %vm570_vm3, %v569_v34, 0  ;;  %vm651_vm3 = vweird.f32 %v1358_v28 }
 0x173   : > { %v573_v37 = vand.u32 31, %v571_v36  ;;  %v572_v40 = vshrl.u32 %v571_v36, 5 }
 0x175   : > { %v574_v39 = vsub.s32 32, %v573_v37  ;;  %v576_v42 = vshll.u32 %v1234_v41, %v573_v37  ;;  %v579_v44 = vshll.u32 %v1235_v43, %v573_v37  ;;  %v582_v48 = vshll.u32 %v1236_v46, %v573_v37 }
 0x176   : > { %v585_v51 = vshll.u32 %v1237_v49, %v573_v37  ;;  %v588_v54 = vshll.u32 %v1238_v52, %v573_v37  ;;  %vm591_vm4 = vcmp.lt.s32.totalorder %v572_v40, 1  ;;  %vm594_vm5 = vcmp.lt.s32.totalorder %v572_v40, 4 }
 0x177   : > { %v577_v45 = vshrl.u32 %v1235_v43, %v574_v39  ;;  %v580_v47 = vshrl.u32 %v1236_v46, %v574_v39  ;;  %v583_v50 = vshrl.u32 %v1237_v49, %v574_v39  ;;  %v586_v53 = vshrl.u32 %v1238_v52, %v574_v39 }
 0x178   : > { %v589_v56 = vshrl.u32 %v1239_v55, %v574_v39  ;;  %v575_v2 = vshrl.u32 %v1234_v41, %v574_v39  ;;  %vm593_vm6 = vcmp.lt.s32.totalorder %v572_v40, 3  ;;  %vm592_vm7 = vcmp.lt.s32.totalorder %v572_v40, 2 }
 0x179   : > { %v578_v58 = vor.u32 %v577_v45, %v576_v42  ;;  %v581_v59 = vor.u32 %v580_v47, %v579_v44  ;;  %v584_v60 = vor.u32 %v583_v50, %v582_v48  ;;  %v587_v61 = vor.u32 %v586_v53, %v585_v51  ;;  %v1073_v42 = vld [vmem:[%s1409_s3] ss:$0 sm:$0xff] }
 0x17a   : > { %v590_v62 = vor.u32 %v589_v56, %v588_v54  ;;  %v472_v45 = vadd.f32 %v1073_v42, %v1356_v26 }
 0x17b   : > { %v596_v63 = vsel %vm594_vm5, %v584_v60, 2102212464  ;;  %v599_v0 = vsel %vm591_vm4, %v578_v58, %v581_v59  ;;  %v603_v1 = vsel %vm591_vm4, %v581_v59, %v584_v60  ;;  %v600_v3 = vsel %vm594_vm5, %v587_v61, 920167782 }
 0x17c   : > { %v604_v4 = vsel %vm594_vm5, %v590_v62, 1326507024  ;;  %v601_v5 = vsel %vm593_vm6, %v584_v60, %v600_v3  ;;  %v595_v8 = vsel %vm591_vm4, %v575_v2, %v578_v58  ;;  %v597_v9 = vsel %vm593_vm6, %v581_v59, %v596_v63 }
 0x17d   : > { %v605_v6 = vsel %vm593_vm6, %v587_v61, %v604_v4  ;;  %v602_v10 = vsel %vm592_vm7, %v599_v0, %v601_v5  ;;  %v598_v16 = vsel %vm592_vm7, %v595_v8, %v597_v9  ;;  %v556_v49 = vmin.f32 %v472_v45, 4.6051702 }
 0x17e   : > { %v606_v11 = vsel %vm592_vm7, %v603_v1, %v605_v6  ;;  %v1367_v14 = vmul.u32.u64.low %v607_v7, %v602_v10  ;;  %v1368_v15 = vmul.u32.u64.high %v607_v7, %v602_v10, %v1367_v14  ;;  %v614_v18 = vmul.u32 %v607_v7, %v598_v16 }
 0x17f   : > { %v1364_v12 = vmul.u32.u64.low %v607_v7, %v606_v11  ;;  %v1365_v13 = vmul.u32.u64.high %v607_v7, %v606_v11, %v1364_v12  ;;  %v557_v54 = vmul.f32 1.442695, %v556_v49  ;;  %vm772_vm4 = vcmask 130048  }
 0x180   : > { %v617_v17 = vadd.s32 1, %v1368_v15  ;;  %vm919_vm5 = vcmask 31744  }
 0x181   : > { %vm616_vm8 = vc.u32 %v1365_v13, %v1367_v14  ;;  %v615_v32 = vadd.s32 %v1367_v14, %v1365_v13 }
 0x182   : > { %v618_v19 = vsel %vm616_vm8, %v617_v17, %v1368_v15 }
 0x183   : > { %v619_v20 = vadd.s32 %v618_v19, %v614_v18 }
 0x185   : > { %v620_v21 = vadd.s32 536870912, %v619_v20 }
 0x187   : > { %v621_v22 = vshrl.u32 %v620_v21, 30 }
 0x189   : > { %v622_v23 = vshll.u32 %v621_v22, 30  ;;  %v645_v47 = vsub.s32 4, %v621_v22 }
 0x18b   : > { %v623_v24 = vsub.s32 %v619_v20, %v622_v23  ;;  %v646_v51 = vsel %vm561_vm10, %v645_v47, %v621_v22 }
 0x18c   : > { %v648_v53 = vsel %vm560_vm11, 0, %v646_v51 }
 0x18d   : > { %v625_v25 = vsub.s32 0, %v623_v24  ;;  %v756_v55 = vadd.s32 3, %v648_v53  ;;  %v652_v26 = vand.u32 3, %v648_v53 }
 0x18f   : > { %v1078_v27 = vmin.u32 %v625_v25, %v623_v24  ;;  %v757_v56 = vand.u32 3, %v756_v55  ;;  %vm657_vm13 = vcmp.eq.s32.totalorder %v652_v26, 2  ;;  %vm654_vm15 = vcmp.eq.s32.totalorder %v652_v26, 0 }
 0x190   : > { %vm653_vm2 = vcmp.lt.s32.totalorder %v652_v26, 2 }
 0x191   : > { %v627_v29 = vclz %v1078_v27  ;;  %vm762_vm12 = vcmp.eq.s32.totalorder %v757_v56, 2  ;;  %vm759_vm14 = vcmp.eq.s32.totalorder %v757_v56, 0  ;;  %vm758_vm1 = vcmp.lt.s32.totalorder %v757_v56, 2 }
 0x193   : > { %v1079_v30 = vadd.s32 4294967294, %v627_v29 }
 0x195   : > { %vm1080_vm9 = vcmp.lt.s32.totalorder %v1079_v30, 0 }
 0x196   : > { %v630_v31 = vsel %vm1080_vm9, 0, %v1079_v30 }
 0x197   : > { %v631_v33 = vsub.s32 32, %v630_v31  ;;  %v635_v34 = vsub.s32 4294967266, %v630_v31  ;;  %v632_v36 = vshll.u32 %v623_v24, %v630_v31 }
 0x199   : > { %v633_v37 = vshrl.u32 %v615_v32, %v631_v33  ;;  %v636_v38 = vadd.s32 127, %v635_v34 }
 0x19b   : > { %v634_v39 = vor.u32 %v633_v37, %v632_v36  ;;  %v637_v40 = vshll.u32 %v636_v38, 23 }
 0x19d   : > { %v638_v41 = vor.u32 4788187, %v637_v40  ;;  %v641_v44 = vcvt.s32.f32 %v634_v39 }
 0x19f   : > { %v639_v43 = vand.u32 2147483647, %v638_v41 }
 0x1a1   : > { %v642_v46 = vmul.f32 %v641_v44, %v639_v43 }
 0x1a3   : > { %v643_v48 = vxor.u32 2147483648, %v642_v46 }
 0x1a5   : > { %v644_v50 = vsel %vm561_vm10, %v643_v48, %v642_v46 }
 0x1a6   : > { %v647_v52 = vsel %vm560_vm11, %v1358_v28, %v644_v50 }
 0x1a7   : > { %1201 = vcosq.f32 %v647_v52 }
 0x1a8   : > { %1203 = vsinq.f32 %v647_v52 }
 0x1a9   : > { %1205 = vpow2.f32 %v557_v54 }
 0x1b1   : > { %v1202_v57 = vpop.eup %1201 }
 0x1b2   : > { %v1204_v58 = vpop.eup %1203  ;;  %v658_v59 = vxor.u32 2147483648, %v1202_v57 }
 0x1b3   : > { %v655_v60 = vxor.u32 2147483648, %v1204_v58  ;;  %v1206_v2 = vpop.eup %1205 }
 0x1b4   : > { %v764_v35 = vsel %vm762_vm12, %v658_v59, %v1204_v58  ;;  %v659_v61 = vsel %vm657_vm13, %v658_v59, %v1204_v58 }
 0x1b5   : > { %v761_v62 = vsel %vm759_vm14, %v1202_v57, %v655_v60  ;;  %v656_v63 = vsel %vm654_vm15, %v1202_v57, %v655_v60 }
 0x1b6   : > { %v765_v0 = vsel %vm758_vm1, %v761_v62, %v764_v35  ;;  %v660_v1 = vsel %vm653_vm2, %v656_v63, %v659_v61 }
 0x1b7   : > { %v766_v3 = vsel %vm651_vm3, nan, %v765_v0  ;;  %v661_v4 = vsel %vm651_vm3, nan, %v660_v1 }
 0x1b8   : > { %v767_v5 = vmul.f32 %v1206_v2, %v766_v3  ;;  %v662_v6 = vmul.f32 %v1206_v2, %v661_v4 }
 0x1ba   : > { %1133 = vmatmul.mubr.msk.f32.vlgmr.msra.gmra.mrb[2].mxu1 %vm772_vm4, %v767_v5  ;;  %1140 = vmatmul.mubr.msk.f32.vlgmr.msra.gmra.mrb[2].mxu0 %vm772_vm4, %v662_v6 }
 0x28d   : > { %v842_v7 = vpop.f32.mrb[2].mxu1  ;;  %v915_v8 = vpop.f32.mrb[2].mxu0 }
 0x28e   : > { %v916_v9 = vadd.f32 %v915_v8, %v842_v7  ;;  %v1134_v10 = vpop.f32.mrb[3].mxu1  ;;  %v1141_v11 = vpop.f32.mrb[3].mxu0 }
 0x290   : > { %920 = vst.msk [vmem:[#allocation2] sm:$0xff] %vm919_vm5, %v916_v9  ;;  %925 = vrot.lane.b32.xlu1 %v916_v9, %s1240_s23 }
 0x294   : > { %931 = vrot.lane.b32.xlu1 %v916_v9, %s1241_s24 }
 0x297   : > { %v923_v12 = vld [vmem:[#allocation2 + $0x1] sm:$0xff] }
 0x298   : > { %937 = vrot.lane.b32.xlu1 %v916_v9, %s1242_s25 }
 0x302   : > { %v926_v28 = vpop.permute.xlu1 %925 }
 0x303   : > { %v928_v13 = vadd.f32 %v926_v28, %v923_v12 }
 0x305   : > { %929 = vst.msk [vmem:[#allocation2 + $0x1] sm:$0xff] %vm919_vm5, %v928_v13 }
 0x306   : > { %v932_v14 = vpop.permute.xlu1 %931 }
 0x30a   : > { %v938_v17 = vpop.permute.xlu1 %937 }
 0x30c   : > { %v930_v15 = vld [vmem:[#allocation2 + $0x2] sm:$0xff] }
 0x30d   : > { %v934_v16 = vadd.f32 %v932_v14, %v930_v15 }
 0x30f   : > { %935 = vst.msk [vmem:[#allocation2 + $0x2] sm:$0xff] %vm919_vm5, %v934_v16 }
 0x316   : > { %v936_v18 = vld [vmem:[#allocation2 + $0x3] sm:$0xff] }
 0x317   : > { %v940_v19 = vadd.f32 %v938_v17, %v936_v18 }
 0x319   : > { %941 = vst.msk [vmem:[#allocation2 + $0x3] sm:$0xff] %vm919_vm5, %v940_v19 }
 0x320   : > { %v942_v20 = vld [vmem:[#allocation2] sm:$0xff]  ;;  %v944_v21 = vld [vmem:[#allocation2 + $0x8] sm:$0x7] }
 0x321   : > { %943 = vst.msk [vmem:[%s346_s12] sm:$0xff] %vm919_vm5, %v942_v20 }
 0x322   : > { %945 = vst.msk [vmem:[%s353_s15] sm:$0x7] %vm921_vm0, %v944_v21 }
 0x323 PF: > { %s19_s29 = sadd.s32 1, %s1229_s29   ;;  %s1415_s27 = smov %s1225_s28 }
 0x324   : > { %p16_p5 = scmp.ge.s32.totalorder %s19_s29, 4   ;;  %s1416_s28 = smov %s1418_s30 }
 0x326   :  { %18 = sbr.rel (!%p16_p5) target bundleno = 2 (0x2), region = 90 }

</bundles_post_ra>
